<compile_context>
chip_gen: v7x
topology: tpu7x:2x2x1
jax: 0.10.0
libtpu: 0.0.40
codegen_flags: <defaults>
</compile_context>

<pallas_src>
import functools
import math

import jax
import jax.numpy as jnp
from jax import lax
from jax.experimental import pallas as pl
from jax.experimental.pallas import tpu as pltpu


def _round_up(x: int, m: int) -> int:
    return ((x + m - 1) // m) * m


def _sublane(dtype) -> int:
    # native sublane packing: 8 rows for 4-byte, 16 for 2-byte, 32 for 1-byte
    return {1: 32, 2: 16, 4: 8}.get(jnp.dtype(dtype).itemsize, 8)


def _velpred_head_kernel(x_ref, w_ref, b_ref, o_ref, *, scale: float, offset: float):
    # x_ref: (TM, H)   w_ref: (TV, H)  [nn.Linear layout, NOT transposed]
    # b_ref: (1, TV)   o_ref: (TM, TV)
    # x0 @ W^T via dot_general contracting dim 1 of both operands; f32 accumulation.
    y = lax.dot_general(
        x_ref[...], w_ref[...],
        dimension_numbers=(((1,), (1,)), ((), ())),
        preferred_element_type=jnp.float32,
    )
    y = y + b_ref[...].astype(jnp.float32)
    # vel_min + (y + 1) * (vel_max - vel_min) * 0.5  ==  offset + scale * y
    o_ref[...] = (y * scale + offset).astype(o_ref.dtype)


def velpred_head(sequence_output, weight, bias, *, vel_min, vel_max,
                 row_tile: int = 256, v_tile: int = 4096,
                 vmem_budget_bytes: int = 24 * 1024 * 1024):
    """sequence_output: (B, S, H); weight: (V, H) (nn.Linear layout); bias: (V,).

    vel_min / vel_max must be static Python scalars (folded at trace time).
    """
    B, S, H = sequence_output.shape
    V, H_w = weight.shape
    assert H_w == H, "weight must be (vel_size, hidden_size)"

    # mean over [:, :1, :] is the identity on token 0; Linear outputs for
    # tokens 1..S-1 never reach the result, so drop them before the matmul.
    # TODO(synk): folding this token-0 slice into the kernel's BlockSpec would
    # need a size-1 sublane block on the S axis; kept as a tiny (B*H) XLA slice.
    x0 = sequence_output[:, 0, :]                              # (B, H)

    x_isz = jnp.dtype(sequence_output.dtype).itemsize
    w_isz = jnp.dtype(weight.dtype).itemsize
    itemsize = max(x_isz, w_isz)

    # --- row (batch) tiling: dtype-native sublane multiple ----------------
    sub = _sublane(sequence_output.dtype)
    tm = min(_round_up(row_tile, sub), _round_up(B, sub))
    rows_pad = _round_up(B, tm)
    if rows_pad != B:
        x0 = jnp.pad(x0, ((0, rows_pad - B), (0, 0)))
    n_rows = rows_pad // tm

    # --- output (vel_size) tiling: 128-multiple divisor of round_up(V,128) --
    v_pad = _round_up(V, 128)
    # VMEM cap: double-buffered (tv,H) weight slab + (tm,H) x + (tm,tv) out.
    cap = (vmem_budget_bytes // (2 * itemsize) - tm * H) // (H + tm)
    cap = max(128, (cap // 128) * 128)
    tv_max = min(v_tile, cap, v_pad)
    if n_rows == 1 and v_pad >= 256:
        # leave >= 2 V-steps so both v7x TensorCores get work
        tv_max = min(tv_max, max(128, v_pad // 2))
    tv = 128
    for cand in range(max(128, (tv_max // 128) * 128), 127, -128):
        if v_pad % cand == 0:
            tv = cand
            break
    n_v = v_pad // tv

    # Pad W rows / bias only if V is not already a 128 multiple (<128 rows).
    w = weight
    if v_pad != V:
        w = jnp.pad(w, ((0, v_pad - V), (0, 0)))
        bias = jnp.pad(bias, (0, v_pad - V))
    b2d = bias.reshape(1, v_pad)

    # Grid: V outermost so the weight slab stays VMEM-resident while row tiles
    # cycle -> W is read from HBM exactly once regardless of batch size.
    grid = (n_v, n_rows)

    # Fold the affine rescale into compile-time constants.
    scale = 0.5 * (float(vel_max) - float(vel_min))
    offset = float(vel_min) + scale

    out_isz = x_isz
    cost = pl.CostEstimate(
        flops=2 * B * H * V,
        transcendentals=0,
        bytes_accessed=(rows_pad * H * x_isz
                        + v_pad * H * w_isz
                        + v_pad * jnp.dtype(b2d.dtype).itemsize
                        + rows_pad * v_pad * out_isz),
    )

    need = 2 * (tv * H * w_isz + tm * H * x_isz + tm * tv * out_isz) + 2 * tv * w_isz
    vmem_limit = int(min(max(32 * 1024 * 1024, need + (4 << 20)), 64 * 1024 * 1024))

    kernel = functools.partial(_velpred_head_kernel, scale=scale, offset=offset)

    out = pl.pallas_call(
        kernel,
        out_shape=jax.ShapeDtypeStruct((rows_pad, v_pad), sequence_output.dtype),
        grid_spec=pltpu.PrefetchScalarGridSpec(
            num_scalar_prefetch=0,
            grid=grid,
            in_specs=[
                pl.BlockSpec((tm, H), lambda j, i: (i, 0)),    # token-0 activations
                pl.BlockSpec((tv, H), lambda j, i: (j, 0)),    # weight row slab (V,H)
                pl.BlockSpec((1, tv), lambda j, i: (0, j)),    # bias slab
            ],
            out_specs=pl.BlockSpec((tm, tv), lambda j, i: (i, j)),
        ),
        compiler_params=pltpu.CompilerParams(
            dimension_semantics=("parallel", "parallel"),
            vmem_limit_bytes=vmem_limit,
        ),
        cost_estimate=cost,
    )(x0, w, b2d)

    return out[:B, :V]


def reference(sequence_output, weight, bias, vel_min, vel_max):
    y = sequence_output.astype(jnp.float32) @ weight.astype(jnp.float32).T \
        + bias.astype(jnp.float32)                             # (B, S, V)
    out = jnp.mean(y[:, :1, :], axis=1)                        # (B, V)
    return vel_min + (out + 1.0) * (vel_max - vel_min) * 0.5


if __name__ == "__main__":
    # Small config consistent with the module: hidden_size=32, vel_size=128.
    B, S, H, V = 2, 8, 32, 128
    vel_min, vel_max = 1.5, 4.5

    key = jax.random.PRNGKey(0)
    kx, kw, kb = jax.random.split(key, 3)

    x = jax.random.normal(kx, (B, S, H), dtype=jnp.float32)
    # nn.Linear(hidden_size, vel_size): weight (V, H), bias (V,)
    w = jax.random.normal(kw, (V, H), dtype=jnp.float32) / math.sqrt(H)
    b = 0.01 * jax.random.normal(kb, (V,), dtype=jnp.float32)

    # f32 path (validated tightly against the reference)
    out = jax.block_until_ready(velpred_head(x, w, b, vel_min=vel_min, vel_max=vel_max))
    ref = reference(x, w, b, vel_min, vel_max)
    assert out.shape == (B, V)
    assert jnp.allclose(out, ref, atol=2e-4, rtol=2e-4), "f32 mismatch vs reference"

    # bf16 weight/activation path (halves W HBM traffic; f32 MXU accumulation)
    xb, wb, bb = (x.astype(jnp.bfloat16), w.astype(jnp.bfloat16), b.astype(jnp.bfloat16))
    out_bf16 = jax.block_until_ready(
        velpred_head(xb, wb, bb, vel_min=vel_min, vel_max=vel_max))
    ref_bf16 = reference(xb, wb, bb, vel_min, vel_max)
    assert out_bf16.shape == (B, V)
    assert jnp.allclose(out_bf16.astype(jnp.float32), ref_bf16, atol=5e-2, rtol=5e-2), \
        "bf16 mismatch vs reference"

    print("KERNEL_OK")
</pallas_src>

<mosaic_0001>
module attributes {stable_mosaic.version = 11 : i64} {
  func.func @_velpred_head_kernel(%arg0: i32, %arg1: i32, %arg2: memref<8x32xf32, #tpu.memory_space<vmem>>, %arg3: memref<128x32xf32, #tpu.memory_space<vmem>>, %arg4: memref<1x128xf32, #tpu.memory_space<vmem>>, %arg5: memref<8x128xf32, #tpu.memory_space<vmem>>) attributes {dimension_semantics = [#tpu.dimension_semantics<parallel>, #tpu.dimension_semantics<parallel>], iteration_bounds = array<i64: 1, 1>, scalar_prefetch = 0 : i64, scratch_operands = 0 : i64, tpu.core_type = #tpu.core_type<tc>, window_params = [{transform_indices = @transform_0, window_bounds = array<i64: 8, 32>}, {transform_indices = @transform_1, window_bounds = array<i64: 128, 32>}, {transform_indices = @transform_2, window_bounds = array<i64: 1, 128>}, {transform_indices = @transform_3, window_bounds = array<i64: 8, 128>}]} {
    %c0 = arith.constant 0 : index
    %c0_0 = arith.constant 0 : index
    %0 = vector.load %arg2[%c0, %c0_0] : memref<8x32xf32, #tpu.memory_space<vmem>>, vector<8x32xf32>
    %c0_1 = arith.constant 0 : index
    %c0_2 = arith.constant 0 : index
    %1 = vector.load %arg3[%c0_1, %c0_2] : memref<128x32xf32, #tpu.memory_space<vmem>>, vector<128x32xf32>
    %cst = arith.constant dense<0.000000e+00> : vector<8x128xf32>
    %2 = tpu.matmul %0, %1, %cst {dimension_numbers = #tpu.dot_dimension_numbers<[1], [1], [0], [0], [0, 0, 1, 0], [], []>} : vector<8x32xf32>, vector<128x32xf32>, vector<8x128xf32> -> vector<8x128xf32>
    %c0_3 = arith.constant 0 : index
    %c0_4 = arith.constant 0 : index
    %3 = vector.load %arg4[%c0_3, %c0_4] : memref<1x128xf32, #tpu.memory_space<vmem>>, vector<1x128xf32>
    %4 = vector.broadcast %3 : vector<1x128xf32> to vector<8x128xf32>
    %5 = arith.addf %2, %4 : vector<8x128xf32>
    %cst_5 = arith.constant 1.500000e+00 : f32
    %6 = vector.broadcast %cst_5 : f32 to vector<8x128xf32>
    %7 = arith.mulf %5, %6 : vector<8x128xf32>
    %cst_6 = arith.constant 3.000000e+00 : f32
    %8 = vector.broadcast %cst_6 : f32 to vector<8x128xf32>
    %9 = arith.addf %7, %8 : vector<8x128xf32>
    %c0_7 = arith.constant 0 : index
    %c0_8 = arith.constant 0 : index
    %10 = vector.load %arg5[%c0_7, %c0_8] : memref<8x128xf32, #tpu.memory_space<vmem>>, vector<8x128xf32>
    tpu.vector_store %arg5[%c0_7, %c0_8], %9 {strides = array<i32>} : memref<8x128xf32, #tpu.memory_space<vmem>>, vector<8x128xf32>,
    return
  }
  func.func @transform_0(%arg0: i32, %arg1: i32) -> (i32, i32) {
    %c0_i32 = arith.constant 0 : i32
    %c0_i32_0 = arith.constant 0 : i32
    return %arg1, %c0_i32 : i32, i32
  }
  func.func @transform_1(%arg0: i32, %arg1: i32) -> (i32, i32) {
    %c0_i32 = arith.constant 0 : i32
    %c0_i32_0 = arith.constant 0 : i32
    return %arg0, %c0_i32 : i32, i32
  }
  func.func @transform_2(%arg0: i32, %arg1: i32) -> (i32, i32) {
    %c0_i32 = arith.constant 0 : i32
    %c0_i32_0 = arith.constant 0 : i32
    return %c0_i32, %arg0 : i32, i32
  }
  func.func @transform_3(%arg0: i32, %arg1: i32) -> (i32, i32) {
    %c0_i32 = arith.constant 0 : i32
    return %arg1, %arg0 : i32, i32
  }
}

</mosaic_0001>

<bundles_post_ra>
// kernel: tpu_custom_call.1
= control target key start
LH: loop header
LB: loop body
LE: loop exit
PB: predicated region body
PF: predicated region fallthrough
CT: control target
= control target key end

     0   :  { %vm39_vm0 = vcmask 261120   ;;  %v308_v2 = vmov 0.0|0.0   ;;  %vm309_vm2 = vmmov 0   ;;  %v310_v5 = vmov 0.0   ;;  %s421_s0 = inlined_call_operand.vmem [shape: f32[8,32], index: 0, kind: input, shape index: {}]   ;;  %s422_s1 = inlined_call_operand.vmem [shape: f32[128,32], index: 1, kind: input, shape index: {}]   ;;  %s423_s2 = inlined_call_operand.vmem [shape: f32[1,128], index: 2, kind: input, shape index: {}]   ;;  %s424_s3 = inlined_call_operand.hbm [shape: f32[8,128], index: 3, kind: output, shape index: {}]  }
   0x1   :  { %v16_v0 = vld [vmem:[%s422_s1] sm:$0xff]  ;;  %v17_v1 = vld [vmem:[%s422_s1 + $0x8] sm:$0xff]  ;;  %248 = vmatprep.subr.bf16.mxu0 %v308_v2  ;;  %vm340_vm1 = vmpackc.low %vm39_vm0, %vm39_vm0  ;;  %245 = vmatprep.mubr.msk.f32.mxu0 %vm309_vm2, %v310_v5 }
   0x2   :  { %v249_v3 = vpack.c.bf16 %v17_v1, %v16_v0  ;;  %v18_v6 = vld [vmem:[%s422_s1 + $0x10] sm:$0xff]  ;;  %v19_v7 = vld [vmem:[%s422_s1 + $0x18] sm:$0xff] }
   0x4   :  { %251 = vmatpush3.bf16.xpose.msk.msra.mxu0 %vm340_vm1, %v249_v3 }
   0x5   :  { %252 = vmatprep.subr.bf16.mxu0 %v308_v2 }
   0x6   :  { %8 = vsyncpa [#allocation3], 0  ;;  %v253_v8 = vpack.c.bf16 %v19_v7, %v18_v6  ;;  %v20_v9 = vld [vmem:[%s422_s1 + $0x20] sm:$0xff]  ;;  %v21_v10 = vld [vmem:[%s422_s1 + $0x28] sm:$0xff]  ;;  %s311_s21 = smov [#allocation2]  }
   0x7   :  { %v257_v11 = vpack.c.bf16 %v21_v10, %v20_v9  ;;  %v22_v12 = vld [vmem:[%s422_s1 + $0x30] sm:$0xff]  ;;  %v23_v13 = vld [vmem:[%s422_s1 + $0x38] sm:$0xff]  ;;  %v24_v15 = vld [vmem:[%s422_s1 + $0x40] sm:$0xff]  ;;  %s170_s22 = sshll.u32 %s311_s21, 4  ;;  %s171_s22 = int_to_ptr.vmem [resolvable:$true] %s170_s22 }
   0x8   :  { %v261_v14 = vpack.c.bf16 %v23_v13, %v22_v12  ;;  %v25_v16 = vld [vmem:[%s422_s1 + $0x48] sm:$0xff]  ;;  %v26_v18 = vld [vmem:[%s422_s1 + $0x50] sm:$0xff]  ;;  %v27_v19 = vld [vmem:[%s422_s1 + $0x58] sm:$0xff]  ;;  %p289_p1 = scmp.lt.s32.totalorder %s171_s22, %s171_s22 }
   0x9   :  { %v265_v17 = vpack.c.bf16 %v25_v16, %v24_v15  ;;  %v269_v20 = vpack.c.bf16 %v27_v19, %v26_v18  ;;  %v28_v21 = vld [vmem:[%s422_s1 + $0x60] sm:$0xff]  ;;  %v29_v22 = vld [vmem:[%s422_s1 + $0x68] sm:$0xff]  ;;  %v30_v24 = vld [vmem:[%s422_s1 + $0x70] sm:$0xff] }
   0xa   :  { %v273_v23 = vpack.c.bf16 %v29_v22, %v28_v21  ;;  %v31_v25 = vld [vmem:[%s422_s1 + $0x78] sm:$0xff]  ;;  %v15_v27 = vld [vmem:[%s421_s0] sm:$0xff]  ;;  %s284_s1 = scalar_lea.vmem %s171_s22, 128 }
   0xb   :  { %v277_v26 = vpack.c.bf16 %v31_v25, %v30_v24  ;;  %v178_v28 = vld [vmem:[%s423_s2] ss:$0 sm:$0xff]  ;;  %p285_p0 = scmp.ne.s32.totalorder %s171_s22, %s284_s1  ;;  %p290_p2 = scmp.lt.s32.totalorder %s284_s1, %s284_s1 }
   0xc   :  { %255 = vmatpush3.bf16.xpose.msk.msra.mxu0 %vm340_vm1, %v253_v8 }
   0xd   :  { %256 = vmatprep.subr.bf16.mxu0 %v308_v2  ;;  %p291_p3 = por %p290_p2, %p289_p1 }
   0xf   :  { %p292_p4 = pnand %p291_p3, %p285_p0 }
  0x14   :  { %259 = vmatpush3.bf16.xpose.msk.msra.mxu0 %vm340_vm1, %v257_v11 }
  0x15   :  { %260 = vmatprep.subr.bf16.mxu0 %v308_v2 }
  0x1c   :  { %263 = vmatpush3.bf16.xpose.msk.msra.mxu0 %vm340_vm1, %v261_v14 }
  0x1d   :  { %264 = vmatprep.subr.bf16.mxu0 %v308_v2 }
  0x24   :  { %267 = vmatpush3.bf16.xpose.msk.msra.mxu0 %vm340_vm1, %v265_v17 }
  0x25   :  { %268 = vmatprep.subr.bf16.mxu0 %v308_v2 }
  0x2c   :  { %271 = vmatpush3.bf16.xpose.msk.msra.mxu0 %vm340_vm1, %v269_v20 }
  0x2d   :  { %272 = vmatprep.subr.bf16.mxu0 %v308_v2 }
  0x34   :  { %275 = vmatpush3.bf16.xpose.msk.msra.mxu0 %vm340_vm1, %v273_v23 }
  0x35   :  { %276 = vmatprep.subr.bf16.mxu0 %v308_v2 }
  0x3c   :  { %279 = vmatpush3.bf16.xpose.msk.msra.mxu0 %vm340_vm1, %v277_v26 }
  0x43   :  { %246 = vmatmul.mubr.msk.f32.vlgmr.msra.gmra.mrb[0].mxu0 %vm39_vm0, %v15_v27 }
 0x116   :  { %v157_v29 = vpop.f32.mrb[0].mxu0 }
 0x117   :  { %v158_v30 = vadd.f32 %v178_v28, %v157_v29  ;;  %v247_v31 = vpop.f32.mrb[1].mxu0 }
 0x119   :  { %v161_v32 = vmul.f32 1.5, %v158_v30 }
 0x11b   :  { %v162_v33 = vadd.f32 3.0, %v161_v32 }
 0x11d   :  { %163 = vst [vmem:[#allocation2] sm:$0xff] %v162_v33 }
 0x11e   :  { %295 = shalt.err (!%p292_p4)
}
 0x11f   :  { %s296_s2 = scalar_lea.hbm %s424_s3, 128 }
 0x120   :  { %p297_p5 = scmp.ne.s32.totalorder %s424_s3, %s296_s2  ;;  %p300_p6 = scmp.lt.u32.totalorder %s296_s2, %s424_s3 }
 0x122   :  { %p302_p7 = pnand %p300_p6, %p297_p5 }
 0x124   :  { %305 = shalt.err (!%p302_p7)
}
 0x125   :  { %173 = dma.vmem_to_hbm [thread:$0]  %s171_s22, 128, %s424_s3, [#allocation3]  }
 0x126   :  { %306 = dma.done.wait [#allocation3], 128  }
 0x127   :  { %307 = vsyncadd [#allocation3], 4294967168 }
 0x128   :  { %177 = vsyncpa [#allocation3], 1 }

</bundles_post_ra>
